<compile_context>
chip_gen: v7x
topology: tpu7x:2x2x1
jax: 0.10.0
libtpu: 0.0.40
codegen_flags: <defaults>
</compile_context>

<pallas_src>
import functools

import jax
import jax.numpy as jnp
from jax.experimental import pallas as pl
from jax.experimental.pallas import tpu as pltpu

FOCAL_ALPHA = 0.25
FOCAL_GAMMA = 2.0          # handled as an explicit square below
DICE_SMOOTH = 1e-6
HYBRID_ALPHA = 0.5
LANES = 128
SUBLANES = 8
PAD_LOGIT = -100.0         # sigmoid ~ 0, focal == 0, so padding needs no mask


def _cdiv(a, b):
    return -(-a // b)


def _round_up(a, b):
    return _cdiv(a, b) * b


def _hybrid_partials_kernel(p_ref, t_ref, out_ref, acc_ref, *,
                            tile_rows, num_steps, last_valid_rows, mask_last):
    """Accumulates [sum(focal), sum(sig*t), sum(sig), sum(t)] over all steps."""
    s = pl.program_id(0)

    @pl.when(s == 0)
    def _():
        acc_ref[...] = jnp.zeros_like(acc_ref)

    def accumulate(x, t):
        # Shared transcendentals: e = exp(-|x|) reused by sigmoid, bce and pt.
        e = jnp.exp(-jnp.abs(x))
        inv = 1.0 / (1.0 + e)                       # exact recip (accuracy)
        sig = jnp.where(x >= 0.0, inv, e * inv)     # sigmoid(x)
        relu_x = jnp.maximum(x, 0.0)
        # Numerically stable BCE-with-logits (matches PyTorch):
        #   bce = max(x,0) - x*t + log(1 + exp(-|x|))
        bce = relu_x - x * t + jnp.log1p(e)
        # pt = exp(-bce); kept exact so soft labels stay correct.
        pt = jnp.exp(x * t - relu_x) * inv
        omp = 1.0 - pt
        focal = FOCAL_ALPHA * omp * omp * bce       # gamma == 2 -> square

        # Vector partial sums: pure VPU adds into the (8,128) accumulators.
        sub = tile_rows // SUBLANES
        acc_ref[0] += jnp.sum(focal.reshape(sub, SUBLANES, LANES), axis=0)
        acc_ref[1] += jnp.sum((sig * t).reshape(sub, SUBLANES, LANES), axis=0)
        acc_ref[2] += jnp.sum(sig.reshape(sub, SUBLANES, LANES), axis=0)
        acc_ref[3] += jnp.sum(t.reshape(sub, SUBLANES, LANES), axis=0)

    if not mask_last:
        accumulate(p_ref[...].astype(jnp.float32),
                   t_ref[...].astype(jnp.float32))
    else:
        # Only the FINAL step sees a partial edge block (stale/garbage rows
        # beyond the array); mask it there and only there.
        if num_steps > 1:
            @pl.when(s != num_steps - 1)
            def _():
                accumulate(p_ref[...].astype(jnp.float32),
                           t_ref[...].astype(jnp.float32))

        @pl.when(s == num_steps - 1)
        def _():
            row = jax.lax.broadcasted_iota(jnp.int32, (tile_rows, LANES), 0)
            valid = row < last_valid_rows
            x = jnp.where(valid, p_ref[...].astype(jnp.float32), PAD_LOGIT)
            t = jnp.where(valid, t_ref[...].astype(jnp.float32), 0.0)
            accumulate(x, t)

    # Single full (XLU) reduction for the whole call, on the last step only.
    @pl.when(s == num_steps - 1)
    def _():
        out_ref[0, 0] = jnp.sum(acc_ref[0])
        out_ref[0, 1] = jnp.sum(acc_ref[1])
        out_ref[0, 2] = jnp.sum(acc_ref[2])
        out_ref[0, 3] = jnp.sum(acc_ref[3])


def hybrid_loss(preds, targets, *, max_tile_rows=4096):
    """HybridLoss(alpha=0.5) over arbitrary-shaped preds/targets (e.g. NCHW)."""
    assert preds.shape == targets.shape
    total = preds.size
    max_tile_rows = max(SUBLANES, (max_tile_rows // SUBLANES) * SUBLANES)

    p_flat = preds.reshape(-1)
    t_flat = targets.reshape(-1)

    # Pad only when the lane-dense (rows, 128) reshape forces it (or the tensor
    # is smaller than one (8,128) tile).  Pad values are chosen so that padded
    # elements contribute (exactly / negligibly) zero to every partial sum,
    # hence no per-step mask is needed for this padding.
    if total % LANES != 0 or total < SUBLANES * LANES:
        padded_total = _round_up(max(total, SUBLANES * LANES), SUBLANES * LANES)
        pad = padded_total - total
        p_flat = jnp.pad(p_flat, (0, pad), constant_values=PAD_LOGIT)
        t_flat = jnp.pad(t_flat, (0, pad), constant_values=0)
    else:
        padded_total = total

    rows = padded_total // LANES                 # rows >= 8 here
    tr = min(max_tile_rows, (rows // SUBLANES) * SUBLANES)   # multiple of 8, <= rows
    steps = _cdiv(rows, tr)
    mask_last = (steps * tr) != rows             # partial edge block on last step
    last_valid_rows = rows - (steps - 1) * tr

    p2 = p_flat.reshape(rows, LANES)
    t2 = t_flat.reshape(rows, LANES)

    kernel = functools.partial(
        _hybrid_partials_kernel,
        tile_rows=tr, num_steps=steps,
        last_valid_rows=last_valid_rows, mask_last=mask_last,
    )

    partials = pl.pallas_call(
        kernel,
        out_shape=jax.ShapeDtypeStruct((1, 4), jnp.float32),
        grid_spec=pltpu.PrefetchScalarGridSpec(
            num_scalar_prefetch=0,
            grid=(steps,),
            in_specs=[
                pl.BlockSpec((tr, LANES), lambda s: (s, 0)),
                pl.BlockSpec((tr, LANES), lambda s: (s, 0)),
            ],
            out_specs=pl.BlockSpec(
                (1, 4), lambda s: (0, 0), memory_space=pltpu.SMEM
            ),
            scratch_shapes=[pltpu.VMEM((4, SUBLANES, LANES), jnp.float32)],
        ),
        compiler_params=pltpu.CompilerParams(
            dimension_semantics=("arbitrary",),
            vmem_limit_bytes=48 * 1024 * 1024,
        ),
    )(p2, t2)

    # Assemble the scalar loss (trivial ops on 4 scalars).
    sums = partials[0]
    focal_mean = sums[0] / jnp.float32(total)
    dice_score = (2.0 * sums[1] + DICE_SMOOTH) / (sums[2] + sums[3] + DICE_SMOOTH)
    dice_loss = 1.0 - dice_score
    return HYBRID_ALPHA * focal_mean + (1.0 - HYBRID_ALPHA) * dice_loss


def _reference(preds, targets):
    x = preds.astype(jnp.float32)
    t = targets.astype(jnp.float32)
    bce = jnp.maximum(x, 0.0) - x * t + jnp.log1p(jnp.exp(-jnp.abs(x)))
    pt = jnp.exp(-bce)
    focal = (FOCAL_ALPHA * (1.0 - pt) ** FOCAL_GAMMA * bce).mean()
    sig = jax.nn.sigmoid(x)
    dice = (2.0 * jnp.sum(sig * t) + DICE_SMOOTH) / (
        jnp.sum(sig) + jnp.sum(t) + DICE_SMOOTH
    )
    return HYBRID_ALPHA * focal + (1.0 - HYBRID_ALPHA) * (1.0 - dice)


if __name__ == "__main__":
    key = jax.random.PRNGKey(0)

    # Primary test: NCHW batch=2, channels=4, spatial=16x16 (2048 elements).
    # rows=16, single full block, no padding, no mask.
    kp, kt, key = jax.random.split(key, 3)
    preds = jax.random.normal(kp, (2, 4, 16, 16), dtype=jnp.float32)
    targets = (
        jax.random.uniform(kt, (2, 4, 16, 16), dtype=jnp.float32) > 0.5
    ).astype(jnp.float32)
    loss = jax.block_until_ready(hybrid_loss(preds, targets))
    ref = jax.block_until_ready(_reference(preds, targets))
    assert jnp.allclose(loss, ref, rtol=1e-5, atol=1e-5), (loss, ref)

    # Ragged size (exercises the negative-logit padded tail, no in-kernel mask).
    kp2, kt2, key = jax.random.split(key, 3)
    preds2 = jax.random.normal(kp2, (2, 3, 15, 15), dtype=jnp.float32)
    targets2 = (
        jax.random.uniform(kt2, (2, 3, 15, 15), dtype=jnp.float32) > 0.5
    ).astype(jnp.float32)
    loss2 = jax.block_until_ready(hybrid_loss(preds2, targets2))
    ref2 = jax.block_until_ready(_reference(preds2, targets2))
    assert jnp.allclose(loss2, ref2, rtol=1e-5, atol=1e-5), (loss2, ref2)

    # Lane-aligned but row-ragged size (exercises the multi-step grid with a
    # partial edge block masked only on the final step; zero wrapper padding).
    kp3, kt3 = jax.random.split(key)
    preds3 = jax.random.normal(kp3, (2, 5, 16, 16), dtype=jnp.float32)   # 2560 elems -> 20 rows
    targets3 = (
        jax.random.uniform(kt3, (2, 5, 16, 16), dtype=jnp.float32) > 0.5
    ).astype(jnp.float32)
    loss3 = jax.block_until_ready(hybrid_loss(preds3, targets3))
    ref3 = jax.block_until_ready(_reference(preds3, targets3))
    assert jnp.allclose(loss3, ref3, rtol=1e-5, atol=1e-5), (loss3, ref3)

    print("KERNEL_OK")
</pallas_src>

<mosaic_0001>
module attributes {stable_mosaic.version = 11 : i64} {
  func.func @_hybrid_partials_kernel(%arg0: i32, %arg1: memref<16x128xf32, #tpu.memory_space<vmem>>, %arg2: memref<16x128xf32, #tpu.memory_space<vmem>>, %arg3: memref<1x4xf32, #tpu.memory_space<smem>>, %arg4: memref<4x8x128xf32, #tpu.memory_space<vmem>>) attributes {dimension_semantics = [#tpu.dimension_semantics<arbitrary>], iteration_bounds = array<i64: 1>, scalar_prefetch = 0 : i64, scratch_operands = 1 : i64, tpu.core_type = #tpu.core_type<tc>, window_params = [{transform_indices = @transform_0, window_bounds = array<i64: 16, 128>}, {transform_indices = @transform_1, window_bounds = array<i64: 16, 128>}, {transform_indices = @transform_2, window_bounds = array<i64: 1, 4>}]} {
    %c0_i32 = arith.constant 0 : i32
    %0 = arith.cmpi eq, %arg0, %c0_i32 : i32
    %1 = arith.extui %0 : i1 to i32
    %c0_i32_0 = arith.constant 0 : i32
    %2 = arith.cmpi ne, %1, %c0_i32_0 : i32
    scf.if %2 {
      %cst_37 = arith.constant 0.000000e+00 : f32
      %69 = vector.broadcast %cst_37 : f32 to vector<4x8x128xf32>
      %c0_38 = arith.constant 0 : index
      %c0_39 = arith.constant 0 : index
      %c0_40 = arith.constant 0 : index
      %70 = vector.load %arg4[%c0_38, %c0_39, %c0_40] : memref<4x8x128xf32, #tpu.memory_space<vmem>>, vector<4x8x128xf32>
      tpu.vector_store %arg4[%c0_38, %c0_39, %c0_40], %69 {strides = array<i32>} : memref<4x8x128xf32, #tpu.memory_space<vmem>>, vector<4x8x128xf32>,
    } else {
    }
    %c0 = arith.constant 0 : index
    %c0_1 = arith.constant 0 : index
    %3 = vector.load %arg1[%c0, %c0_1] : memref<16x128xf32, #tpu.memory_space<vmem>>, vector<16x128xf32>
    %c0_2 = arith.constant 0 : index
    %c0_3 = arith.constant 0 : index
    %4 = vector.load %arg2[%c0_2, %c0_3] : memref<16x128xf32, #tpu.memory_space<vmem>>, vector<16x128xf32>
    %5 = math.absf %3 : vector<16x128xf32>
    %cst = arith.constant 0.000000e+00 : f32
    %6 = vector.broadcast %cst : f32 to vector<16x128xf32>
    %7 = arith.subf %6, %5 : vector<16x128xf32>
    %8 = math.exp %7 : vector<16x128xf32>
    %cst_4 = arith.constant 1.000000e+00 : f32
    %9 = vector.broadcast %cst_4 : f32 to vector<16x128xf32>
    %10 = arith.addf %9, %8 : vector<16x128xf32>
    %cst_5 = arith.constant 1.000000e+00 : f32
    %11 = vector.broadcast %cst_5 : f32 to vector<16x128xf32>
    %12 = arith.divf %11, %10 : vector<16x128xf32>
    %cst_6 = arith.constant 0.000000e+00 : f32
    %13 = vector.broadcast %cst_6 : f32 to vector<16x128xf32>
    %14 = arith.cmpf oge, %3, %13 : vector<16x128xf32>
    %15 = arith.mulf %8, %12 : vector<16x128xf32>
    %16 = arith.select %14, %12, %15 : vector<16x128xi1>, vector<16x128xf32>
    %cst_7 = arith.constant 0.000000e+00 : f32
    %17 = vector.broadcast %cst_7 : f32 to vector<16x128xf32>
    %18 = arith.maximumf %3, %17 : vector<16x128xf32>
    %19 = arith.mulf %3, %4 : vector<16x128xf32>
    %20 = arith.subf %18, %19 : vector<16x128xf32>
    %21 = math.log1p %8 : vector<16x128xf32>
    %22 = arith.addf %20, %21 : vector<16x128xf32>
    %23 = arith.mulf %3, %4 : vector<16x128xf32>
    %24 = arith.subf %23, %18 : vector<16x128xf32>
    %25 = math.exp %24 : vector<16x128xf32>
    %26 = arith.mulf %25, %12 : vector<16x128xf32>
    %cst_8 = arith.constant 1.000000e+00 : f32
    %27 = vector.broadcast %cst_8 : f32 to vector<16x128xf32>
    %28 = arith.subf %27, %26 : vector<16x128xf32>
    %cst_9 = arith.constant 2.500000e-01 : f32
    %29 = vector.broadcast %cst_9 : f32 to vector<16x128xf32>
    %30 = arith.mulf %29, %28 : vector<16x128xf32>
    %31 = arith.mulf %30, %28 : vector<16x128xf32>
    %32 = arith.mulf %31, %22 : vector<16x128xf32>
    %c0_10 = arith.constant 0 : index
    %c0_11 = arith.constant 0 : index
    %c0_12 = arith.constant 0 : index
    %33 = vector.load %arg4[%c0_10, %c0_11, %c0_12] : memref<4x8x128xf32, #tpu.memory_space<vmem>>, vector<1x8x128xf32>
    %34 = vector.shape_cast %33 : vector<1x8x128xf32> to vector<8x128xf32>
    %35 = vector.shape_cast %32 : vector<16x128xf32> to vector<2x8x128xf32>
    %cst_13 = arith.constant dense<0.000000e+00> : vector<8x128xf32>
    %36 = vector.multi_reduction <add>, %35, %cst_13 [0] : vector<2x8x128xf32> to vector<8x128xf32>
    %37 = arith.addf %34, %36 : vector<8x128xf32>
    %c0_14 = arith.constant 0 : index
    %c0_15 = arith.constant 0 : index
    %c0_16 = arith.constant 0 : index
    %38 = vector.load %arg4[%c0_14, %c0_15, %c0_16] : memref<4x8x128xf32, #tpu.memory_space<vmem>>, vector<1x8x128xf32>
    %39 = vector.shape_cast %38 : vector<1x8x128xf32> to vector<8x128xf32>
    %40 = vector.shape_cast %37 : vector<8x128xf32> to vector<1x8x128xf32>
    tpu.vector_store %arg4[%c0_14, %c0_15, %c0_16], %40 {strides = array<i32>} : memref<4x8x128xf32, #tpu.memory_space<vmem>>, vector<1x8x128xf32>,
    %c1 = arith.constant 1 : index
    %c0_17 = arith.constant 0 : index
    %c0_18 = arith.constant 0 : index
    %41 = vector.load %arg4[%c1, %c0_17, %c0_18] : memref<4x8x128xf32, #tpu.memory_space<vmem>>, vector<1x8x128xf32>
    %42 = vector.shape_cast %41 : vector<1x8x128xf32> to vector<8x128xf32>
    %43 = arith.mulf %16, %4 : vector<16x128xf32>
    %44 = vector.shape_cast %43 : vector<16x128xf32> to vector<2x8x128xf32>
    %cst_19 = arith.constant dense<0.000000e+00> : vector<8x128xf32>
    %45 = vector.multi_reduction <add>, %44, %cst_19 [0] : vector<2x8x128xf32> to vector<8x128xf32>
    %46 = arith.addf %42, %45 : vector<8x128xf32>
    %c1_20 = arith.constant 1 : index
    %c0_21 = arith.constant 0 : index
    %c0_22 = arith.constant 0 : index
    %47 = vector.load %arg4[%c1_20, %c0_21, %c0_22] : memref<4x8x128xf32, #tpu.memory_space<vmem>>, vector<1x8x128xf32>
    %48 = vector.shape_cast %47 : vector<1x8x128xf32> to vector<8x128xf32>
    %49 = vector.shape_cast %46 : vector<8x128xf32> to vector<1x8x128xf32>
    tpu.vector_store %arg4[%c1_20, %c0_21, %c0_22], %49 {strides = array<i32>} : memref<4x8x128xf32, #tpu.memory_space<vmem>>, vector<1x8x128xf32>,
    %c2 = arith.constant 2 : index
    %c0_23 = arith.constant 0 : index
    %c0_24 = arith.constant 0 : index
    %50 = vector.load %arg4[%c2, %c0_23, %c0_24] : memref<4x8x128xf32, #tpu.memory_space<vmem>>, vector<1x8x128xf32>
    %51 = vector.shape_cast %50 : vector<1x8x128xf32> to vector<8x128xf32>
    %52 = vector.shape_cast %16 : vector<16x128xf32> to vector<2x8x128xf32>
    %cst_25 = arith.constant dense<0.000000e+00> : vector<8x128xf32>
    %53 = vector.multi_reduction <add>, %52, %cst_25 [0] : vector<2x8x128xf32> to vector<8x128xf32>
    %54 = arith.addf %51, %53 : vector<8x128xf32>
    %c2_26 = arith.constant 2 : index
    %c0_27 = arith.constant 0 : index
    %c0_28 = arith.constant 0 : index
    %55 = vector.load %arg4[%c2_26, %c0_27, %c0_28] : memref<4x8x128xf32, #tpu.memory_space<vmem>>, vector<1x8x128xf32>
    %56 = vector.shape_cast %55 : vector<1x8x128xf32> to vector<8x128xf32>
    %57 = vector.shape_cast %54 : vector<8x128xf32> to vector<1x8x128xf32>
    tpu.vector_store %arg4[%c2_26, %c0_27, %c0_28], %57 {strides = array<i32>} : memref<4x8x128xf32, #tpu.memory_space<vmem>>, vector<1x8x128xf32>,
    %c3 = arith.constant 3 : index
    %c0_29 = arith.constant 0 : index
    %c0_30 = arith.constant 0 : index
    %58 = vector.load %arg4[%c3, %c0_29, %c0_30] : memref<4x8x128xf32, #tpu.memory_space<vmem>>, vector<1x8x128xf32>
    %59 = vector.shape_cast %58 : vector<1x8x128xf32> to vector<8x128xf32>
    %60 = vector.shape_cast %4 : vector<16x128xf32> to vector<2x8x128xf32>
    %cst_31 = arith.constant dense<0.000000e+00> : vector<8x128xf32>
    %61 = vector.multi_reduction <add>, %60, %cst_31 [0] : vector<2x8x128xf32> to vector<8x128xf32>
    %62 = arith.addf %59, %61 : vector<8x128xf32>
    %c3_32 = arith.constant 3 : index
    %c0_33 = arith.constant 0 : index
    %c0_34 = arith.constant 0 : index
    %63 = vector.load %arg4[%c3_32, %c0_33, %c0_34] : memref<4x8x128xf32, #tpu.memory_space<vmem>>, vector<1x8x128xf32>
    %64 = vector.shape_cast %63 : vector<1x8x128xf32> to vector<8x128xf32>
    %65 = vector.shape_cast %62 : vector<8x128xf32> to vector<1x8x128xf32>
    tpu.vector_store %arg4[%c3_32, %c0_33, %c0_34], %65 {strides = array<i32>} : memref<4x8x128xf32, #tpu.memory_space<vmem>>, vector<1x8x128xf32>,
    %c0_i32_35 = arith.constant 0 : i32
    %66 = arith.cmpi eq, %arg0, %c0_i32_35 : i32
    %67 = arith.extui %66 : i1 to i32
    %c0_i32_36 = arith.constant 0 : i32
    %68 = arith.cmpi ne, %67, %c0_i32_36 : i32
    scf.if %68 {
      %c0_37 = arith.constant 0 : index
      %c0_38 = arith.constant 0 : index
      %c0_39 = arith.constant 0 : index
      %69 = vector.load %arg4[%c0_37, %c0_38, %c0_39] : memref<4x8x128xf32, #tpu.memory_space<vmem>>, vector<1x8x128xf32>
      %70 = vector.shape_cast %69 : vector<1x8x128xf32> to vector<8x128xf32>
      %71 = vector.shape_cast %70 : vector<8x128xf32> to vector<1x8x128xf32>
      %cst_40 = arith.constant dense<0.000000e+00> : vector<1xf32>
      %72 = vector.multi_reduction <add>, %71, %cst_40 [1, 2] : vector<1x8x128xf32> to vector<1xf32>
      %73 = vector.shape_cast %72 : vector<1xf32> to vector<1x1x1xf32>
      %74 = vector.extract %73[0, 0, 0] : f32 from vector<1x1x1xf32>
      %c0_41 = arith.constant 0 : index
      %c0_42 = arith.constant 0 : index
      %75 = memref.load %arg3[%c0_41, %c0_42] : memref<1x4xf32, #tpu.memory_space<smem>>
      memref.store %74, %arg3[%c0_41, %c0_42] : memref<1x4xf32, #tpu.memory_space<smem>>
      %c1_43 = arith.constant 1 : index
      %c0_44 = arith.constant 0 : index
      %c0_45 = arith.constant 0 : index
      %76 = vector.load %arg4[%c1_43, %c0_44, %c0_45] : memref<4x8x128xf32, #tpu.memory_space<vmem>>, vector<1x8x128xf32>
      %77 = vector.shape_cast %76 : vector<1x8x128xf32> to vector<8x128xf32>
      %78 = vector.shape_cast %77 : vector<8x128xf32> to vector<1x8x128xf32>
      %cst_46 = arith.constant dense<0.000000e+00> : vector<1xf32>
      %79 = vector.multi_reduction <add>, %78, %cst_46 [1, 2] : vector<1x8x128xf32> to vector<1xf32>
      %80 = vector.shape_cast %79 : vector<1xf32> to vector<1x1x1xf32>
      %81 = vector.extract %80[0, 0, 0] : f32 from vector<1x1x1xf32>
      %c0_47 = arith.constant 0 : index
      %c1_48 = arith.constant 1 : index
      %82 = memref.load %arg3[%c0_47, %c1_48] : memref<1x4xf32, #tpu.memory_space<smem>>
      memref.store %81, %arg3[%c0_47, %c1_48] : memref<1x4xf32, #tpu.memory_space<smem>>
      %c2_49 = arith.constant 2 : index
      %c0_50 = arith.constant 0 : index
      %c0_51 = arith.constant 0 : index
      %83 = vector.load %arg4[%c2_49, %c0_50, %c0_51] : memref<4x8x128xf32, #tpu.memory_space<vmem>>, vector<1x8x128xf32>
      %84 = vector.shape_cast %83 : vector<1x8x128xf32> to vector<8x128xf32>
      %85 = vector.shape_cast %84 : vector<8x128xf32> to vector<1x8x128xf32>
      %cst_52 = arith.constant dense<0.000000e+00> : vector<1xf32>
      %86 = vector.multi_reduction <add>, %85, %cst_52 [1, 2] : vector<1x8x128xf32> to vector<1xf32>
      %87 = vector.shape_cast %86 : vector<1xf32> to vector<1x1x1xf32>
      %88 = vector.extract %87[0, 0, 0] : f32 from vector<1x1x1xf32>
      %c0_53 = arith.constant 0 : index
      %c2_54 = arith.constant 2 : index
      %89 = memref.load %arg3[%c0_53, %c2_54] : memref<1x4xf32, #tpu.memory_space<smem>>
      memref.store %88, %arg3[%c0_53, %c2_54] : memref<1x4xf32, #tpu.memory_space<smem>>
      %c3_55 = arith.constant 3 : index
      %c0_56 = arith.constant 0 : index
      %c0_57 = arith.constant 0 : index
      %90 = vector.load %arg4[%c3_55, %c0_56, %c0_57] : memref<4x8x128xf32, #tpu.memory_space<vmem>>, vector<1x8x128xf32>
      %91 = vector.shape_cast %90 : vector<1x8x128xf32> to vector<8x128xf32>
      %92 = vector.shape_cast %91 : vector<8x128xf32> to vector<1x8x128xf32>
      %cst_58 = arith.constant dense<0.000000e+00> : vector<1xf32>
      %93 = vector.multi_reduction <add>, %92, %cst_58 [1, 2] : vector<1x8x128xf32> to vector<1xf32>
      %94 = vector.shape_cast %93 : vector<1xf32> to vector<1x1x1xf32>
      %95 = vector.extract %94[0, 0, 0] : f32 from vector<1x1x1xf32>
      %c0_59 = arith.constant 0 : index
      %c3_60 = arith.constant 3 : index
      %96 = memref.load %arg3[%c0_59, %c3_60] : memref<1x4xf32, #tpu.memory_space<smem>>
      memref.store %95, %arg3[%c0_59, %c3_60] : memref<1x4xf32, #tpu.memory_space<smem>>
    } else {
    }
    return
  }
  func.func @transform_0(%arg0: i32) -> (i32, i32) {
    %c0_i32 = arith.constant 0 : i32
    %c0_i32_0 = arith.constant 0 : i32
    return %arg0, %c0_i32 : i32, i32
  }
  func.func @transform_1(%arg0: i32) -> (i32, i32) {
    %c0_i32 = arith.constant 0 : i32
    %c0_i32_0 = arith.constant 0 : i32
    return %arg0, %c0_i32 : i32, i32
  }
  func.func @transform_2(%arg0: i32) -> (i32, i32) {
    %c0_i32 = arith.constant 0 : i32
    %c0_i32_0 = arith.constant 0 : i32
    %c0_i32_1 = arith.constant 0 : i32
    return %c0_i32, %c0_i32_0 : i32, i32
  }
}

</mosaic_0001>

<bundles_post_ra>
// kernel: tpu_custom_call.1
= control target key start
LH: loop header
LB: loop body
LE: loop exit
PB: predicated region body
PF: predicated region fallthrough
CT: control target
= control target key end

     0   :  { %7 = vsyncpa [#allocation4], 0  ;;  %s357_s0 = inlined_call_operand.hbm [shape: f32[16,128], index: 0, kind: input, shape index: {}]   ;;  %s358_s1 = inlined_call_operand.hbm [shape: f32[16,128], index: 1, kind: input, shape index: {}]   ;;  %s359_s2 = inlined_call_operand.hbm [shape: f32[1,4], index: 2, kind: output, shape index: {}]  }
   0x1   :  { %8 = vsyncpa [#allocation7], 0 }
   0x2   :  { %9 = vsyncpa [#allocation5], 0  ;;  %s290_s9 = smov [#allocation3]   ;;  %s230_s13 = scalar_lea.hbm %s357_s0, 256 }
   0x3   :  { %s15_s10 = sshll.u32 %s290_s9, 4  ;;  %p231_p0 = scmp.ne.s32.totalorder %s357_s0, %s230_s13  ;;  %s16_s10 = int_to_ptr.vmem [resolvable:$true] %s15_s10 }
   0x4   :  { %p234_p1 = scmp.lt.u32.totalorder %s230_s13, %s357_s0 }
   0x6   :  { %p236_p2 = pnand %p234_p1, %p231_p0 }
   0x8   :  { %239 = shalt.err (!%p236_p2)
}
   0x9   :  { %s240_s18 = scalar_lea.vmem %s16_s10, 256  ;;  %p245_p4 = scmp.lt.s32.totalorder %s16_s10, %s16_s10 }
   0xa   :  { %p241_p3 = scmp.ne.s32.totalorder %s16_s10, %s240_s18  ;;  %p246_p5 = scmp.lt.s32.totalorder %s240_s18, %s240_s18 }
   0xc   :  { %p247_p6 = por %p246_p5, %p245_p4 }
   0xe   :  { %p248_p7 = pnand %p247_p6, %p241_p3 }
  0x10   :  { %251 = shalt.err (!%p248_p7)
}
  0x11   :  { %s291_s19 = smov 128   ;;  %s292_s20 = smov 8  }
  0x12   :  { %21 = dma.hbm_to_vmem [thread:$0]  %s357_s0, 256, %s16_s10, [#allocation4], %s291_s19, %s291_s19, %s292_s20  }
  0x13   :  { %s293_s23 = smov [#allocation6]   ;;  %s252_s27 = scalar_lea.hbm %s358_s1, 256 }
  0x14   :  { %s27_s24 = sshll.u32 %s293_s23, 4  ;;  %p253_p8 = scmp.ne.s32.totalorder %s358_s1, %s252_s27  ;;  %s28_s24 = int_to_ptr.vmem [resolvable:$true] %s27_s24 }
  0x15   :  { %p256_p9 = scmp.lt.u32.totalorder %s252_s27, %s358_s1 }
  0x17   :  { %p258_p10 = pnand %p256_p9, %p253_p8 }
  0x19   :  { %261 = shalt.err (!%p258_p10)
}
  0x1a   :  { %s262_s4 = scalar_lea.vmem %s28_s24, 256  ;;  %p267_p12 = scmp.lt.s32.totalorder %s28_s24, %s28_s24 }
  0x1b   :  { %p263_p11 = scmp.ne.s32.totalorder %s28_s24, %s262_s4  ;;  %p268_p13 = scmp.lt.s32.totalorder %s262_s4, %s262_s4 }
  0x1d   :  { %p269_p0 = por %p268_p13, %p267_p12 }
  0x1f   :  { %p270_p1 = pnand %p269_p0, %p263_p11 }
  0x21   :  { %273 = shalt.err (!%p270_p1)
}
  0x22   :  { %33 = dma.hbm_to_vmem [thread:$0]  %s358_s1, 256, %s28_s24, [#allocation7], %s291_s19, %s291_s19, %s292_s20  }
  0x23   :  { %284 = dma.done.wait [#allocation4], 256  }
  0x24   :  { %285 = vsyncadd [#allocation4], 4294967040 }
  0x25   :  { %286 = dma.done.wait [#allocation7], 256  }
  0x26   :  { %287 = vsyncadd [#allocation7], 4294967040  ;;  %v48_v0 = vld [vmem:[#allocation3] sm:$0xff]  ;;  %v49_v1 = vld [vmem:[#allocation3 + $0x8] sm:$0xff]  ;;  %s274_s11 = scalar_lea.hbm %s359_s2, 16 }
  0x27   :  { %v52_v2 = vand.u32 2147483647, %v48_v0  ;;  %v53_v3 = vand.u32 2147483647, %v49_v1  ;;  %v334_v4 = vld [vmem:[#allocation6] sm:$0xff]  ;;  %v336_v7 = vld [vmem:[#allocation6 + $0x8] sm:$0xff]  ;;  %p275_p2 = scmp.ne.s32.totalorder %s359_s2, %s274_s11  ;;  %p278_p3 = scmp.lt.u32.totalorder %s274_s11, %s359_s2 }
  0x28   :  { %v74_v10 = vmul.f32 %v334_v4, %v48_v0  ;;  %v72_v11 = vmax.f32 %v48_v0, 0.0  ;;  %v75_v12 = vmul.f32 %v336_v7, %v49_v1  ;;  %v73_v13 = vmax.f32 %v49_v1, 0.0 }
  0x29   :  { %v54_v5 = vsub.f32 0.0, %v52_v2  ;;  %v55_v6 = vsub.f32 0.0, %v53_v3  ;;  %vm66_vm0 = vcmp.ge.f32.partialorder %v48_v0, 0.0  ;;  %vm67_vm1 = vcmp.ge.f32.partialorder %v49_v1, 0.0  ;;  %p280_p4 = pnand %p278_p3, %p275_p2 }
  0x2a   :  { %v98_v14 = vsub.f32 %v74_v10, %v72_v11  ;;  %v99_v15 = vsub.f32 %v75_v12, %v73_v13  ;;  %v76_v31 = vsub.f32 %v72_v11, %v74_v10  ;;  %v77_v34 = vsub.f32 %v73_v13, %v75_v12 }
  0x2b   :  { %v56_v8 = vmul.f32 1.442695, %v54_v5  ;;  %v58_v9 = vmul.f32 1.442695, %v55_v6  ;;  %v132_v54 = vadd.f32 %v336_v7, %v334_v4 }
  0x2c   :  { %v100_v16 = vmul.f32 1.442695, %v98_v14  ;;  %v102_v17 = vmul.f32 1.442695, %v99_v15 }
  0x2d   :  { %214 = vpow2.f32 %v56_v8 }
  0x2e   :  { %216 = vpow2.f32 %v58_v9 }
  0x2f   :  { %218 = vpow2.f32 %v100_v16 }
  0x30   :  { %220 = vpow2.f32 %v102_v17 }
  0x37   :  { %v215_v18 = vpop.eup %214 }
  0x38   :  { %v217_v19 = vpop.eup %216  ;;  %v60_v20 = vadd.f32 1.0, %v215_v18  ;;  %v81_v22 = vmul.f32 -0.5, %v215_v18  ;;  %v84_v26 = vand.u32 2147483647, %v215_v18 }
  0x39   :  { %v61_v21 = vadd.f32 1.0, %v217_v19  ;;  %v90_v23 = vmul.f32 -0.5, %v217_v19  ;;  %v219_v25 = vpop.eup %218  ;;  %v93_v29 = vand.u32 2147483647, %v217_v19 }
  0x3a   :  { %222 = vrcp.f32 %v60_v20  ;;  %v82_v24 = vadd.f32 1.0, %v81_v22  ;;  %v221_v28 = vpop.eup %220  ;;  %vm85_vm2 = vcmp.lt.f32.partialorder %v84_v26, 0.0004427343 }
  0x3b   :  { %224 = vrcp.f32 %v61_v21  ;;  %v91_v27 = vadd.f32 1.0, %v90_v23  ;;  %vm94_vm3 = vcmp.lt.f32.partialorder %v93_v29, 0.0004427343 }
  0x3c   :  { %226 = vlog2.f32 %v60_v20  ;;  %v83_v35 = vmul.f32 %v215_v18, %v82_v24 }
  0x3d   :  { %228 = vlog2.f32 %v61_v21  ;;  %v92_v39 = vmul.f32 %v217_v19, %v91_v27 }
  0x44   :  { %v223_v30 = vpop.eup %222 }
  0x45   :  { %v225_v32 = vpop.eup %224  ;;  %v68_v33 = vmul.f32 %v223_v30, %v215_v18  ;;  %v104_v36 = vmul.f32 %v223_v30, %v219_v25 }
  0x46   :  { %v227_v37 = vpop.eup %226  ;;  %v69_v38 = vmul.f32 %v225_v32, %v217_v19  ;;  %v105_v40 = vmul.f32 %v225_v32, %v221_v28 }
  0x47   :  { %v229_v41 = vpop.eup %228  ;;  %v70_v42 = vsel %vm66_vm0, %v223_v30, %v68_v33  ;;  %v80_v43 = vmul.f32 0.6931472, %v227_v37  ;;  %v106_v44 = vsub.f32 1.0, %v104_v36 }
  0x48   :  { %v71_v45 = vsel %vm67_vm1, %v225_v32, %v69_v38  ;;  %v89_v46 = vmul.f32 0.6931472, %v229_v41  ;;  %v107_v47 = vsub.f32 1.0, %v105_v40  ;;  %v120_v60 = vmul.f32 %v70_v42, %v334_v4 }
  0x49   :  { %v127_v48 = vadd.f32 %v71_v45, %v70_v42  ;;  %v86_v49 = vsel %vm85_vm2, %v83_v35, %v80_v43  ;;  %v108_v50 = vmul.f32 0.25, %v106_v44  ;;  %v121_v59 = vmul.f32 %v71_v45, %v336_v7 }
  0x4a   :  { %v95_v51 = vsel %vm94_vm3, %v92_v39, %v89_v46  ;;  %v96_v52 = vadd.f32 %v86_v49, %v76_v31  ;;  %v109_v53 = vmul.f32 0.25, %v107_v47 }
  0x4b   :  { %163 = vadd.xlane.f32.xlu1 %v127_v48  ;;  %v97_v55 = vadd.f32 %v95_v51, %v77_v34  ;;  %v110_v56 = vmul.f32 %v108_v50, %v106_v44  ;;  %v122_v63 = vadd.f32 %v121_v59, %v120_v60 }
  0x4c   :  { %v111_v57 = vmul.f32 %v109_v53, %v107_v47 }
  0x4d   :  { %v112_v58 = vmul.f32 %v110_v56, %v96_v52 }
  0x4e   :  { %v113_v61 = vmul.f32 %v111_v57, %v97_v55 }
  0x4f   :  { %175 = vadd.xlane.f32.xlu1 %v132_v54 }
  0x50   :  { %v115_v62 = vadd.f32 %v113_v61, %v112_v58 }
  0x52   :  { %139 = vadd.xlane.f32.xlu0 %v115_v62 }
  0x56   :  { %151 = vadd.xlane.f32.xlu0 %v122_v63 }
  0xd8   :  { %v164_v0 = vpop.xlane.xlu1 %163 }
  0xd9   :  { %v165_v1 = vrot.slane %v164_v0, 4 }
  0xdb   :  { %v166_v5 = vadd.f32 %v165_v1, %v164_v0 }
  0xdc   :  { %v176_v2 = vpop.xlane.xlu1 %175 }
  0xdd   :  { %v177_v3 = vrot.slane %v176_v2, 4  ;;  %v167_v11 = vrot.slane %v166_v5, 2 }
  0xdf   :  { %v140_v6 = vpop.xlane.xlu0 %139  ;;  %v178_v8 = vadd.f32 %v177_v3, %v176_v2  ;;  %v168_v16 = vadd.f32 %v167_v11, %v166_v5 }
  0xe0   :  { %v141_v9 = vrot.slane %v140_v6, 4 }
  0xe1   :  { %v179_v7 = vrot.slane %v178_v8, 2  ;;  %v169_v22 = vrot.slane %v168_v16, 1 }
  0xe2   :  { %v142_v10 = vadd.f32 %v141_v9, %v140_v6 }
  0xe3   :  { %v152_v12 = vpop.xlane.xlu0 %151  ;;  %v180_v17 = vadd.f32 %v179_v7, %v178_v8  ;;  %v170_v26 = vadd.f32 %v169_v22, %v168_v16 }
  0xe4   :  { %v143_v13 = vrot.slane %v142_v10, 2  ;;  %v153_v4 = vrot.slane %v152_v12, 4 }
  0xe5   :  { %v181_v24 = vrot.slane %v180_v17, 1 }
  0xe6   :  { %v154_v14 = vadd.f32 %v153_v4, %v152_v12  ;;  %v144_v15 = vadd.f32 %v143_v13, %v142_v10 }
  0xe7   :  { %v182_v27 = vadd.f32 %v181_v24, %v180_v17 }
  0xe8   :  { %v155_v18 = vrot.slane %v154_v14, 2  ;;  %v145_v19 = vrot.slane %v144_v15, 1 }
  0xea   :  { %v156_v20 = vadd.f32 %v155_v18, %v154_v14  ;;  %v146_v21 = vadd.f32 %v145_v19, %v144_v15 }
  0xec   :  { %201 = vpush %v146_v21  ;;  %v157_v23 = vrot.slane %v156_v20, 1 }
  0xee   :  { %v158_v25 = vadd.f32 %v157_v23, %v156_v20 }
  0xf0   :  { %203 = vpush %v158_v25 }
  0xf1   :  { %205 = vpush %v170_v26 }
  0xf2   :  { %207 = vpush %v182_v27 }
 0x11d   :  { %s202_s1 = spop %201 }
 0x11e   :  { %149 = sst [smem:[#allocation8]] %s202_s1 }
 0x121   :  { %s204_s6 = spop %203 }
 0x122   :  { %161 = sst [smem:[#allocation8 + $0x1]] %s204_s6  ;;  %s206_s7 = spop %205 }
 0x123   :  { %173 = sst [smem:[#allocation8 + $0x2]] %s206_s7  ;;  %s208_s8 = spop %207 }
 0x124   :  { %185 = sst [smem:[#allocation8 + $0x3]] %s208_s8 }
 0x125   :  { %283 = shalt.err (!%p280_p4)
}
 0x126   :  { %s294_s16 = smov [#allocation8]  }
 0x127   :  { %193 = dma.smem_to_hbm %s294_s16, 16, %s359_s2, [#allocation5]  }
 0x128   :  { %288 = dma.done.wait [#allocation5], 16  }
 0x129   :  { %289 = vsyncadd [#allocation5], 4294967280 }
 0x12a   :  { %197 = sfence }
 0x12b   :  { %198 = vsyncpa [#allocation4], 1 }
 0x12c   :  { %199 = vsyncpa [#allocation7], 1 }
 0x12d   :  { %200 = vsyncpa [#allocation5], 1 }

</bundles_post_ra>
